<compile_context>
chip_gen: v7x
topology: tpu7x:2x2x1
jax: 0.10.0
libtpu: 0.0.40
codegen_flags: <defaults>
</compile_context>

<pallas_src>
import jax
import jax.numpy as jnp
from jax import lax
from jax.experimental import pallas as pl
from jax.experimental.pallas import tpu as pltpu


def _gelu(x):
    # tanh-approximate GELU (EUP-friendly); PyTorch nn.GELU default is erf,
    # but the cell model here is synthetic so the approximation choice is free.
    return jax.nn.gelu(x, approximate=True)


def _round_up(x, m):
    return ((x + m - 1) // m) * m


def cell_model_kernel(x_ref, w1_ref, b1_ref, w2_ref, b2_ref, w3_ref, b3_ref,
                      o_ref):
    """One tile of nodes: (Nt, D) bf16 -> lane-dense (1, Nt) f32 next-states."""
    # Layer 1: bf16 MXU matmul, f32 accumulation, f32 GELU epilogue (VPU/EUP).
    h1 = jnp.dot(x_ref[...], w1_ref[...], preferred_element_type=jnp.float32)
    h1 = _gelu(h1 + b1_ref[...])
    # Layer 2: activations back to bf16 for the MXU, accumulate in f32.
    h2 = jnp.dot(h1.astype(jnp.bfloat16), w2_ref[...],
                 preferred_element_type=jnp.float32)
    h2 = _gelu(h2 + b2_ref[...])
    # Layer 3: contract the hidden axis of (1, H) with the hidden axis of
    # (Nt, H) -> (1, Nt).  The per-node scalars come out already lane-dense,
    # so the store is a full-width vst instead of masked 1-lane column stores.
    out_row = lax.dot_general(
        w3_ref[...], h2,
        dimension_numbers=(((1,), (1,)), ((), ())),
        preferred_element_type=jnp.float32)
    o_ref[...] = (out_row + b3_ref[0]).astype(o_ref.dtype)


def gca_forward(sequences, params, *, node_tile=256):
    """Pallas implementation of GraphCellularAutomata.forward.

    sequences: [num_nodes, max_length, token_size] float32
    returns:   [num_nodes] float32  (per-node next state, already flattened)
    """
    num_nodes, max_length, token_size = sequences.shape
    d_in = max_length * token_size
    hidden = params["w1"].shape[1]

    # --- tile selection ------------------------------------------------------
    # Keep the node tile MXU-friendly (multiple of 128; multiple of 16 covers
    # bf16 sublane packing) and cap it so the per-step working set
    # (double-buffered bf16 x tiles + f32 h1/h2 intermediates) stays well
    # inside the default 32 MiB scoped VMEM and v7x's 64 MiB physical VMEM.
    bytes_per_node = 4 * d_in + 10 * hidden + 8
    vmem_budget = 20 * 1024 * 1024
    max_tile = max(128, (vmem_budget // bytes_per_node) // 128 * 128)
    node_tile = max(128, _round_up(node_tile, 128))
    node_tile = min(node_tile, max_tile)
    # Small problems collapse to a single full tile (still bf16-packable).
    node_tile = min(node_tile, _round_up(num_nodes, 16))

    padded = _round_up(num_nodes, node_tile)
    num_tiles = padded // node_tile

    x = sequences.reshape(num_nodes, d_in)                 # row-major flatten
    if padded != num_nodes:
        x = jnp.pad(x, ((0, padded - num_nodes), (0, 0)))  # tail tile padding

    # bf16 operands for the MXU (in a real pipeline the tokenizer would emit
    # bf16 directly); biases / final layer stay f32, accumulation is f32.
    x_bf = x.astype(jnp.bfloat16)
    w1 = params["w1"].astype(jnp.bfloat16)
    w2 = params["w2"].astype(jnp.bfloat16)
    b1 = params["b1"].astype(jnp.float32).reshape(1, hidden)
    b2 = params["b2"].astype(jnp.float32).reshape(1, hidden)
    w3 = params["w3"].astype(jnp.float32).reshape(1, hidden)   # row form
    b3 = params["b3"].astype(jnp.float32).reshape(1)           # SMEM scalar

    out = pl.pallas_call(
        cell_model_kernel,
        out_shape=jax.ShapeDtypeStruct((1, padded), jnp.float32),
        grid_spec=pltpu.PrefetchScalarGridSpec(
            num_scalar_prefetch=0,
            grid=(num_tiles,),
            in_specs=[
                pl.BlockSpec((node_tile, d_in), lambda i: (i, 0)),   # x tile
                pl.BlockSpec((d_in, hidden),   lambda i: (0, 0)),    # W1 (resident)
                pl.BlockSpec((1, hidden),      lambda i: (0, 0)),    # b1
                pl.BlockSpec((hidden, hidden), lambda i: (0, 0)),    # W2 (resident)
                pl.BlockSpec((1, hidden),      lambda i: (0, 0)),    # b2
                pl.BlockSpec((1, hidden),      lambda i: (0, 0)),    # W3 row
                pl.BlockSpec(memory_space=pltpu.MemorySpace.SMEM),   # b3 scalar
            ],
            out_specs=pl.BlockSpec((1, node_tile), lambda i: (0, i)),
        ),
        compiler_params=pltpu.CompilerParams(
            dimension_semantics=("parallel",)),
    )(x_bf, w1, b1, w2, b2, w3, b3)

    # == result.flatten() in the PyTorch code (drop the padded tail).
    return out.reshape(padded)[:num_nodes]


def init_params(key, d_in, hidden):
    """Deterministic synthetic cell-model parameters (stored f32)."""
    k1, k2, k3 = jax.random.split(key, 3)
    scale1 = 1.0 / jnp.sqrt(d_in)
    scale2 = 1.0 / jnp.sqrt(hidden)
    return {
        "w1": (jax.random.normal(k1, (d_in, hidden), jnp.float32) * scale1),
        "b1": jnp.zeros((1, hidden), jnp.float32),
        "w2": (jax.random.normal(k2, (hidden, hidden), jnp.float32) * scale2),
        "b2": jnp.zeros((1, hidden), jnp.float32),
        "w3": (jax.random.normal(k3, (hidden, 1), jnp.float32) * scale2),
        "b3": jnp.zeros((1, 1), jnp.float32),
    }


def reference_forward(sequences, params):
    """Pure-JAX reference mirroring the kernel's bf16 operand quantization."""
    n, l, t = sequences.shape
    x = sequences.reshape(n, l * t).astype(jnp.bfloat16)
    w1 = params["w1"].astype(jnp.bfloat16)
    w2 = params["w2"].astype(jnp.bfloat16)
    h1 = _gelu(jnp.dot(x, w1, preferred_element_type=jnp.float32)
               + params["b1"].reshape(1, -1))
    h2 = _gelu(jnp.dot(h1.astype(jnp.bfloat16), w2,
                       preferred_element_type=jnp.float32)
               + params["b2"].reshape(1, -1))
    out = h2 @ params["w3"] + params["b3"]
    return out.reshape(n)


if __name__ == "__main__":
    # Small shapes consistent with step(): tokens[num_nodes, max_length, token_size]
    num_nodes, max_length, token_size, hidden = 200, 8, 16, 128
    d_in = max_length * token_size

    key = jax.random.PRNGKey(0)
    k_seq, k_par = jax.random.split(key)
    sequences = jax.random.normal(
        k_seq, (num_nodes, max_length, token_size), jnp.float32)
    params = init_params(k_par, d_in, hidden)

    ref = reference_forward(sequences, params)

    # Default tile (single padded tile for this small problem).
    out = jax.block_until_ready(gca_forward(sequences, params))
    assert out.shape == (num_nodes,)
    assert jnp.allclose(out, ref, atol=2e-2, rtol=2e-2), (out, ref)

    # Explicit smaller tile -> multi-step grid + padded tail tile path.
    out2 = jax.block_until_ready(gca_forward(sequences, params, node_tile=128))
    assert out2.shape == (num_nodes,)
    assert jnp.allclose(out2, ref, atol=2e-2, rtol=2e-2), (out2, ref)

    print("KERNEL_OK")
</pallas_src>

<mosaic_0001>
module attributes {stable_mosaic.version = 11 : i64} {
  func.func @cell_model_kernel(%arg0: i32, %arg1: memref<208x128xbf16, #tpu.memory_space<vmem>>, %arg2: memref<128x128xbf16, #tpu.memory_space<vmem>>, %arg3: memref<1x128xf32, #tpu.memory_space<vmem>>, %arg4: memref<128x128xbf16, #tpu.memory_space<vmem>>, %arg5: memref<1x128xf32, #tpu.memory_space<vmem>>, %arg6: memref<1x128xf32, #tpu.memory_space<vmem>>, %arg7: memref<1xf32, #tpu.memory_space<smem>>, %arg8: memref<1x208xf32, #tpu.memory_space<vmem>>) attributes {dimension_semantics = [#tpu.dimension_semantics<parallel>], iteration_bounds = array<i64: 1>, scalar_prefetch = 0 : i64, scratch_operands = 0 : i64, tpu.core_type = #tpu.core_type<tc>, window_params = [{transform_indices = @transform_0, window_bounds = array<i64: 208, 128>}, {pipeline_mode = #tpu.pipeline_mode<synchronous>, transform_indices = @transform_1, window_bounds = array<i64: 128, 128>}, {pipeline_mode = #tpu.pipeline_mode<synchronous>, transform_indices = @transform_2, window_bounds = array<i64: 1, 128>}, {pipeline_mode = #tpu.pipeline_mode<synchronous>, transform_indices = @transform_3, window_bounds = array<i64: 128, 128>}, {pipeline_mode = #tpu.pipeline_mode<synchronous>, transform_indices = @transform_4, window_bounds = array<i64: 1, 128>}, {pipeline_mode = #tpu.pipeline_mode<synchronous>, transform_indices = @transform_5, window_bounds = array<i64: 1, 128>}, {transform_indices = @transform_6, window_bounds = array<i64: 1>}, {transform_indices = @transform_7, window_bounds = array<i64: 1, 208>}]} {
    %c0 = arith.constant 0 : index
    %c0_0 = arith.constant 0 : index
    %0 = vector.load %arg1[%c0, %c0_0] : memref<208x128xbf16, #tpu.memory_space<vmem>>, vector<208x128xbf16>
    %c0_1 = arith.constant 0 : index
    %c0_2 = arith.constant 0 : index
    %1 = vector.load %arg2[%c0_1, %c0_2] : memref<128x128xbf16, #tpu.memory_space<vmem>>, vector<128x128xbf16>
    %cst = arith.constant dense<0.000000e+00> : vector<208x128xf32>
    %2 = tpu.matmul %0, %1, %cst {dimension_numbers = #tpu.dot_dimension_numbers<[1], [0], [0], [1], [0, 0, 1, 1], [], []>} : vector<208x128xbf16>, vector<128x128xbf16>, vector<208x128xf32> -> vector<208x128xf32>
    %c0_3 = arith.constant 0 : index
    %c0_4 = arith.constant 0 : index
    %3 = vector.load %arg3[%c0_3, %c0_4] : memref<1x128xf32, #tpu.memory_space<vmem>>, vector<1x128xf32>
    %4 = vector.broadcast %3 : vector<1x128xf32> to vector<208x128xf32>
    %5 = arith.addf %2, %4 : vector<208x128xf32>
    %6 = arith.mulf %5, %5 : vector<208x128xf32>
    %7 = arith.mulf %5, %6 : vector<208x128xf32>
    %cst_5 = arith.constant 4.471500e-02 : f32
    %8 = vector.broadcast %cst_5 : f32 to vector<208x128xf32>
    %9 = arith.mulf %8, %7 : vector<208x128xf32>
    %10 = arith.addf %5, %9 : vector<208x128xf32>
    %cst_6 = arith.constant 0.797884583 : f32
    %11 = vector.broadcast %cst_6 : f32 to vector<208x128xf32>
    %12 = arith.mulf %11, %10 : vector<208x128xf32>
    %13 = math.tanh %12 : vector<208x128xf32>
    %cst_7 = arith.constant 1.000000e+00 : f32
    %14 = vector.broadcast %cst_7 : f32 to vector<208x128xf32>
    %15 = arith.addf %14, %13 : vector<208x128xf32>
    %cst_8 = arith.constant 5.000000e-01 : f32
    %16 = vector.broadcast %cst_8 : f32 to vector<208x128xf32>
    %17 = arith.mulf %16, %15 : vector<208x128xf32>
    %18 = arith.mulf %5, %17 : vector<208x128xf32>
    %19 = arith.truncf %18 : vector<208x128xf32> to vector<208x128xbf16>
    %c0_9 = arith.constant 0 : index
    %c0_10 = arith.constant 0 : index
    %20 = vector.load %arg4[%c0_9, %c0_10] : memref<128x128xbf16, #tpu.memory_space<vmem>>, vector<128x128xbf16>
    %cst_11 = arith.constant dense<0.000000e+00> : vector<208x128xf32>
    %21 = tpu.matmul %19, %20, %cst_11 {dimension_numbers = #tpu.dot_dimension_numbers<[1], [0], [0], [1], [0, 0, 1, 1], [], []>} : vector<208x128xbf16>, vector<128x128xbf16>, vector<208x128xf32> -> vector<208x128xf32>
    %c0_12 = arith.constant 0 : index
    %c0_13 = arith.constant 0 : index
    %22 = vector.load %arg5[%c0_12, %c0_13] : memref<1x128xf32, #tpu.memory_space<vmem>>, vector<1x128xf32>
    %23 = vector.broadcast %22 : vector<1x128xf32> to vector<208x128xf32>
    %24 = arith.addf %21, %23 : vector<208x128xf32>
    %25 = arith.mulf %24, %24 : vector<208x128xf32>
    %26 = arith.mulf %24, %25 : vector<208x128xf32>
    %cst_14 = arith.constant 4.471500e-02 : f32
    %27 = vector.broadcast %cst_14 : f32 to vector<208x128xf32>
    %28 = arith.mulf %27, %26 : vector<208x128xf32>
    %29 = arith.addf %24, %28 : vector<208x128xf32>
    %cst_15 = arith.constant 0.797884583 : f32
    %30 = vector.broadcast %cst_15 : f32 to vector<208x128xf32>
    %31 = arith.mulf %30, %29 : vector<208x128xf32>
    %32 = math.tanh %31 : vector<208x128xf32>
    %cst_16 = arith.constant 1.000000e+00 : f32
    %33 = vector.broadcast %cst_16 : f32 to vector<208x128xf32>
    %34 = arith.addf %33, %32 : vector<208x128xf32>
    %cst_17 = arith.constant 5.000000e-01 : f32
    %35 = vector.broadcast %cst_17 : f32 to vector<208x128xf32>
    %36 = arith.mulf %35, %34 : vector<208x128xf32>
    %37 = arith.mulf %24, %36 : vector<208x128xf32>
    %c0_18 = arith.constant 0 : index
    %c0_19 = arith.constant 0 : index
    %38 = vector.load %arg6[%c0_18, %c0_19] : memref<1x128xf32, #tpu.memory_space<vmem>>, vector<1x128xf32>
    %cst_20 = arith.constant dense<0.000000e+00> : vector<1x208xf32>
    %39 = tpu.matmul %38, %37, %cst_20 {dimension_numbers = #tpu.dot_dimension_numbers<[1], [1], [0], [0], [0, 0, 1, 0], [], []>} : vector<1x128xf32>, vector<208x128xf32>, vector<1x208xf32> -> vector<1x208xf32>
    %c0_21 = arith.constant 0 : index
    %40 = memref.load %arg7[%c0_21] : memref<1xf32, #tpu.memory_space<smem>>
    %41 = vector.broadcast %40 : f32 to vector<1x208xf32>
    %42 = arith.addf %39, %41 : vector<1x208xf32>
    %c0_22 = arith.constant 0 : index
    %c0_23 = arith.constant 0 : index
    %43 = vector.load %arg8[%c0_22, %c0_23] : memref<1x208xf32, #tpu.memory_space<vmem>>, vector<1x208xf32>
    tpu.vector_store %arg8[%c0_22, %c0_23], %42 {strides = array<i32>} : memref<1x208xf32, #tpu.memory_space<vmem>>, vector<1x208xf32>,
    return
  }
  func.func @transform_0(%arg0: i32) -> (i32, i32) {
    %c0_i32 = arith.constant 0 : i32
    %c0_i32_0 = arith.constant 0 : i32
    return %arg0, %c0_i32 : i32, i32
  }
  func.func @transform_1(%arg0: i32) -> (i32, i32) {
    %c0_i32 = arith.constant 0 : i32
    %c0_i32_0 = arith.constant 0 : i32
    %c0_i32_1 = arith.constant 0 : i32
    return %c0_i32, %c0_i32_0 : i32, i32
  }
  func.func @transform_2(%arg0: i32) -> (i32, i32) {
    %c0_i32 = arith.constant 0 : i32
    %c0_i32_0 = arith.constant 0 : i32
    %c0_i32_1 = arith.constant 0 : i32
    return %c0_i32, %c0_i32_0 : i32, i32
  }
  func.func @transform_3(%arg0: i32) -> (i32, i32) {
    %c0_i32 = arith.constant 0 : i32
    %c0_i32_0 = arith.constant 0 : i32
    %c0_i32_1 = arith.constant 0 : i32
    return %c0_i32, %c0_i32_0 : i32, i32
  }
  func.func @transform_4(%arg0: i32) -> (i32, i32) {
    %c0_i32 = arith.constant 0 : i32
    %c0_i32_0 = arith.constant 0 : i32
    %c0_i32_1 = arith.constant 0 : i32
    return %c0_i32, %c0_i32_0 : i32, i32
  }
  func.func @transform_5(%arg0: i32) -> (i32, i32) {
    %c0_i32 = arith.constant 0 : i32
    %c0_i32_0 = arith.constant 0 : i32
    %c0_i32_1 = arith.constant 0 : i32
    return %c0_i32, %c0_i32_0 : i32, i32
  }
  func.func @transform_6(%arg0: i32) -> i32 {
    %c0_i32 = arith.constant 0 : i32
    %c0_i32_0 = arith.constant 0 : i32
    return %c0_i32 : i32
  }
  func.func @transform_7(%arg0: i32) -> (i32, i32) {
    %c0_i32 = arith.constant 0 : i32
    %c0_i32_0 = arith.constant 0 : i32
    return %c0_i32, %arg0 : i32, i32
  }
}

</mosaic_0001>

<bundles_post_ra>
// kernel: tpu_custom_call.1
= control target key start
LH: loop header
LB: loop body
LE: loop exit
PB: predicated region body
PF: predicated region fallthrough
CT: control target
= control target key end

     0   :  { %13 = vsyncpa [#allocation4], 0  ;;  %s2269_s0 = inlined_call_operand.hbm [shape: bf16[208,128], index: 0, kind: input, shape index: {}]   ;;  %s2270_s1 = inlined_call_operand.hbm [shape: bf16[128,128], index: 1, kind: input, shape index: {}]   ;;  %s2271_s2 = inlined_call_operand.vmem [shape: f32[1,128], index: 2, kind: input, shape index: {}]   ;;  %s2272_s3 = inlined_call_operand.hbm [shape: bf16[128,128], index: 3, kind: input, shape index: {}]   ;;  %s2273_s4 = inlined_call_operand.vmem [shape: f32[1,128], index: 4, kind: input, shape index: {}]   ;;  %s2274_s5 = inlined_call_operand.vmem [shape: f32[1,128], index: 5, kind: input, shape index: {}]   ;;  %s2275_s6 = inlined_call_operand.<no memory space> [shape: f32[1], index: 6, kind: input, shape index: {}]   ;;  %s2276_s7 = inlined_call_operand.hbm [shape: f32[1,208], index: 7, kind: output, shape index: {}]  }
   0x1   :  { %14 = vsyncpa [#allocation7], 0 }
   0x2   :  { %15 = vsyncpa [#allocation5], 0  ;;  %s1669_s24 = smov [#allocation6]   ;;  %s1670_s26 = smov [#allocation3]  }
   0x3   :  { %s33_s25 = sshll.u32 %s1669_s24, 4  ;;  %s21_s27 = sshll.u32 %s1670_s26, 4  ;;  %s34_s25 = int_to_ptr.vmem [resolvable:$true] %s33_s25  ;;  %s1719_s27 = int_to_ptr.vmem [resolvable:$true] %s21_s27 }
   0x4   :  { %s1575_s30 = scalar_lea.hbm %s2270_s1, 1024 }
   0x5   :  { %p1576_p0 = scmp.ne.s32.totalorder %s2270_s1, %s1575_s30  ;;  %p1579_p1 = scmp.lt.u32.totalorder %s1575_s30, %s2270_s1 }
   0x7   :  { %p1581_p2 = pnand %p1579_p1, %p1576_p0 }
   0x9   :  { %1584 = shalt.err (!%p1581_p2)
}
   0xa   :  { %s1585_s12 = scalar_lea.vmem %s34_s25, 1024  ;;  %p1590_p4 = scmp.lt.s32.totalorder %s34_s25, %s34_s25 }
   0xb   :  { %p1586_p3 = scmp.ne.s32.totalorder %s34_s25, %s1585_s12  ;;  %p1591_p5 = scmp.lt.s32.totalorder %s1585_s12, %s1585_s12 }
   0xd   :  { %p1592_p6 = por %p1591_p5, %p1590_p4 }
   0xf   :  { %p1593_p7 = pnand %p1592_p6, %p1586_p3 }
  0x11   :  { %1596 = shalt.err (!%p1593_p7)
}
  0x12   :  { %s1671_s13 = smov 64   ;;  %s1672_s14 = smov 4  }
  0x13   :  { %39 = dma.hbm_to_vmem [thread:$0]  %s2270_s1, 1024, %s34_s25, [#allocation7], %s1671_s13, %s1671_s13, %s1672_s14  }
  0x14   :  { %s1597_s19 = scalar_lea.hbm %s2269_s0, 1664 }
  0x15   :  { %p1598_p8 = scmp.ne.s32.totalorder %s2269_s0, %s1597_s19  ;;  %p1601_p9 = scmp.lt.u32.totalorder %s1597_s19, %s2269_s0 }
  0x17   :  { %p1603_p10 = pnand %p1601_p9, %p1598_p8 }
  0x19   :  { %1606 = shalt.err (!%p1603_p10)
}
  0x1a   :  { %s1607_s24 = scalar_lea.vmem %s1719_s27, 1664  ;;  %p1612_p12 = scmp.lt.s32.totalorder %s1719_s27, %s1719_s27 }
  0x1b   :  { %p1608_p11 = scmp.ne.s32.totalorder %s1719_s27, %s1607_s24  ;;  %p1613_p13 = scmp.lt.s32.totalorder %s1607_s24, %s1607_s24 }
  0x1d   :  { %p1614_p0 = por %p1613_p13, %p1612_p12 }
  0x1f   :  { %p1615_p1 = pnand %p1614_p0, %p1608_p11 }
  0x21   :  { %1618 = shalt.err (!%p1615_p1)
}
  0x22   :  { %27 = dma.hbm_to_vmem [thread:$0]  %s2269_s0, 1664, %s1719_s27, [#allocation4], %s1671_s13, %s1671_s13, %s1672_s14  }
  0x23   :  { %s1673_s26 = smov [#allocation8]   ;;  %s1619_s8 = scalar_lea.hbm %s2272_s3, 1024 }
  0x24   :  { %s47_s28 = sshll.u32 %s1673_s26, 4  ;;  %p1620_p2 = scmp.ne.s32.totalorder %s2272_s3, %s1619_s8  ;;  %s48_s28 = int_to_ptr.vmem [resolvable:$true] %s47_s28 }
  0x25   :  { %p1623_p3 = scmp.lt.u32.totalorder %s1619_s8, %s2272_s3 }
  0x27   :  { %p1625_p4 = pnand %p1623_p3, %p1620_p2 }
  0x29   :  { %1628 = shalt.err (!%p1625_p4)
}
  0x2a   :  { %s1629_s15 = scalar_lea.vmem %s48_s28, 1024  ;;  %p1634_p6 = scmp.lt.s32.totalorder %s48_s28, %s48_s28 }
  0x2b   :  { %p1630_p5 = scmp.ne.s32.totalorder %s48_s28, %s1629_s15  ;;  %p1635_p7 = scmp.lt.s32.totalorder %s1629_s15, %s1629_s15 }
  0x2d   :  { %p1636_p8 = por %p1635_p7, %p1634_p6 }
  0x2f   :  { %p1637_p9 = pnand %p1636_p8, %p1630_p5 }
  0x31   :  { %1640 = shalt.err (!%p1637_p9)
}
  0x32   :  { %53 = dma.hbm_to_vmem [thread:$0]  %s2272_s3, 1024, %s48_s28, [#allocation7], %s1671_s13, %s1671_s13, %s1672_s14  }
  0x33   :  { %1663 = dma.done.wait [#allocation4], 1664  }
  0x34   :  { %1664 = vsyncadd [#allocation4], 4294965632 }
  0x35   :  { %1665 = dma.done.wait [#allocation7], 2048  }
  0x36   :  { %1666 = vsyncadd [#allocation7], 4294965248  ;;  %v1674_v0 = vmov 0.0   ;;  %vm1675_vm0 = vmmov 0   ;;  %v1442_v1 = vld [vmem:[#allocation6] sm:$0xff]   ;;  %v1443_v2 = vld [vmem:[#allocation6 + $0x8] sm:$0xff]  }
  0x37   :  { %1257 = vmatprep.subr.bf16.mxu0 %v1674_v0  ;;  %1273 = vmatprep.mubr.msk.bf16.mxu0 %vm1675_vm0, %v1674_v0  ;;  %v1444_v3 = vld [vmem:[#allocation6 + $0x10] sm:$0xff]   ;;  %v1445_v4 = vld [vmem:[#allocation6 + $0x18] sm:$0xff]   ;;  %v1446_v5 = vld [vmem:[#allocation6 + $0x20] sm:$0xff]   ;;  %s1678_s19 = smov [#allocation9]  }
  0x38   :  { %1325 = vmatprep.subr.bf16.mxu1 %v1674_v0  ;;  %1341 = vmatprep.mubr.msk.bf16.mxu1 %vm1675_vm0, %v1674_v0  ;;  %v1447_v6 = vld [vmem:[#allocation6 + $0x28] sm:$0xff]   ;;  %v1448_v7 = vld [vmem:[#allocation6 + $0x30] sm:$0xff]   ;;  %v1449_v8 = vld [vmem:[#allocation6 + $0x38] sm:$0xff]   ;;  %s1174_s20 = sshll.u32 %s1678_s19, 4  ;;  %s1175_s20 = int_to_ptr.vmem [resolvable:$true] %s1174_s20 }
  0x39   :  { %1258 = vmatpush3.bf16.msra.mxu0 %v1442_v1  ;;  %v1450_v9 = vld [vmem:[#allocation3] sm:$0xff]   ;;  %v1451_v10 = vld [vmem:[#allocation3 + $0x8] sm:$0xff]   ;;  %v1452_v11 = vld [vmem:[#allocation3 + $0x10] sm:$0xff]   ;;  %p1646_p11 = scmp.lt.s32.totalorder %s1175_s20, %s1175_s20 }
  0x3a   :  { %1259 = vmatprep.subr.bf16.mxu0 %v1674_v0  ;;  %v1453_v12 = vld [vmem:[#allocation3 + $0x18] sm:$0xff]   ;;  %v1454_v13 = vld [vmem:[#allocation3 + $0x20] sm:$0xff]   ;;  %v1455_v14 = vld [vmem:[#allocation3 + $0x28] sm:$0xff]  }
  0x3b   :  { %v1456_v15 = vld [vmem:[#allocation3 + $0x30] sm:$0xff]   ;;  %v1457_v16 = vld [vmem:[#allocation3 + $0x38] sm:$0xff]   ;;  %v1458_v17 = vld [vmem:[#allocation3 + $0x40] sm:$0xff]  }
  0x3c   :  { %v1459_v18 = vld [vmem:[#allocation3 + $0x48] sm:$0xff]   ;;  %v1460_v19 = vld [vmem:[#allocation3 + $0x50] sm:$0xff]   ;;  %v1461_v20 = vld [vmem:[#allocation3 + $0x58] sm:$0xff]  }
  0x3d   :  { %1260 = vmatpush3.bf16.msra.mxu0 %v1443_v2  ;;  %v1463_v21 = vld [vmem:[#allocation8] sm:$0xff]   ;;  %v1464_v22 = vld [vmem:[#allocation8 + $0x8] sm:$0xff]   ;;  %v1462_v23 = vld [vmem:[#allocation3 + $0x60] sm:$0xff]  }
  0x3e   :  { %1261 = vmatprep.subr.bf16.mxu0 %v1674_v0  ;;  %1326 = vmatpush3.bf16.msra.mxu1 %v1463_v21  ;;  %v1465_v24 = vld [vmem:[#allocation8 + $0x10] sm:$0xff]   ;;  %v1466_v25 = vld [vmem:[#allocation8 + $0x18] sm:$0xff]   ;;  %v1467_v26 = vld [vmem:[#allocation8 + $0x20] sm:$0xff]  }
  0x3f   :  { %1327 = vmatprep.subr.bf16.mxu1 %v1674_v0  ;;  %v1468_v27 = vld [vmem:[#allocation8 + $0x28] sm:$0xff]   ;;  %v1469_v28 = vld [vmem:[#allocation8 + $0x30] sm:$0xff]   ;;  %v1470_v29 = vld [vmem:[#allocation8 + $0x38] sm:$0xff]  }
  0x40   :  { %v1819_v30 = vld [vmem:[%s2271_s2] ss:$0 sm:$0xff] }
  0x41   :  { %1262 = vmatpush3.bf16.msra.mxu0 %v1444_v3 }
  0x42   :  { %1263 = vmatprep.subr.bf16.mxu0 %v1674_v0  ;;  %1328 = vmatpush3.bf16.msra.mxu1 %v1464_v22 }
  0x43   :  { %1329 = vmatprep.subr.bf16.mxu1 %v1674_v0 }
  0x45   :  { %1264 = vmatpush3.bf16.msra.mxu0 %v1445_v4 }
  0x46   :  { %1265 = vmatprep.subr.bf16.mxu0 %v1674_v0  ;;  %1330 = vmatpush3.bf16.msra.mxu1 %v1465_v24 }
  0x47   :  { %1331 = vmatprep.subr.bf16.mxu1 %v1674_v0 }
  0x49   :  { %1266 = vmatpush3.bf16.msra.mxu0 %v1446_v5 }
  0x4a   :  { %1267 = vmatprep.subr.bf16.mxu0 %v1674_v0  ;;  %1332 = vmatpush3.bf16.msra.mxu1 %v1466_v25 }
  0x4b   :  { %1333 = vmatprep.subr.bf16.mxu1 %v1674_v0 }
  0x4d   :  { %1268 = vmatpush3.bf16.msra.mxu0 %v1447_v6 }
  0x4e   :  { %1269 = vmatprep.subr.bf16.mxu0 %v1674_v0  ;;  %1334 = vmatpush3.bf16.msra.mxu1 %v1467_v26 }
  0x4f   :  { %1335 = vmatprep.subr.bf16.mxu1 %v1674_v0 }
  0x51   :  { %1270 = vmatpush3.bf16.msra.mxu0 %v1448_v7 }
  0x52   :  { %1271 = vmatprep.subr.bf16.mxu0 %v1674_v0  ;;  %1336 = vmatpush3.bf16.msra.mxu1 %v1468_v27 }
  0x53   :  { %1337 = vmatprep.subr.bf16.mxu1 %v1674_v0 }
  0x55   :  { %1272 = vmatpush3.bf16.msra.mxu0 %v1449_v8 }
  0x56   :  { %1338 = vmatpush3.bf16.msra.mxu1 %v1469_v28 }
  0x57   :  { %1339 = vmatprep.subr.bf16.mxu1 %v1674_v0 }
  0x58   :  { %1274 = vmatmul.mubr.bf16.vlgmr.msra.gmra.mrb[0].mxu0 %v1450_v9 }
  0x59   :  { %1277 = vmatprep.mubr.msk.bf16.mxu0 %vm1675_vm0, %v1674_v0 }
  0x5a   :  { %1340 = vmatpush3.bf16.msra.mxu1 %v1470_v29 }
  0x60   :  { %1278 = vmatmul.mubr.bf16.gmra.mrb[4].mxu0 %v1451_v10 }
  0x61   :  { %1281 = vmatprep.mubr.msk.bf16.mxu0 %vm1675_vm0, %v1674_v0 }
  0x68   :  { %1282 = vmatmul.mubr.bf16.gmra.mrb[8].mxu0 %v1452_v11 }
  0x69   :  { %1285 = vmatprep.mubr.msk.bf16.mxu0 %vm1675_vm0, %v1674_v0 }
  0x70   :  { %1286 = vmatmul.mubr.bf16.gmra.mrb[12].mxu0 %v1453_v12 }
  0x71   :  { %1289 = vmatprep.mubr.msk.bf16.mxu0 %vm1675_vm0, %v1674_v0 }
  0x78   :  { %1290 = vmatmul.mubr.bf16.gmra.mrb[16].mxu0 %v1454_v13 }
  0x79   :  { %1293 = vmatprep.mubr.msk.bf16.mxu0 %vm1675_vm0, %v1674_v0 }
  0x80   :  { %1294 = vmatmul.mubr.bf16.gmra.mrb[20].mxu0 %v1455_v14 }
  0x81   :  { %1297 = vmatprep.mubr.msk.bf16.mxu0 %vm1675_vm0, %v1674_v0 }
  0x88   :  { %1298 = vmatmul.mubr.bf16.gmra.mrb[24].mxu0 %v1456_v15 }
  0x89   :  { %1301 = vmatprep.mubr.msk.bf16.mxu0 %vm1675_vm0, %v1674_v0 }
  0x90   :  { %1302 = vmatmul.mubr.bf16.gmra.mrb[28].mxu0 %v1457_v16 }
  0x91   :  { %1305 = vmatprep.mubr.msk.bf16.mxu0 %vm1675_vm0, %v1674_v0 }
  0x98   :  { %1306 = vmatmul.mubr.bf16.gmra.mrb[32].mxu0 %v1458_v17 }
  0x99   :  { %1309 = vmatprep.mubr.msk.bf16.mxu0 %vm1675_vm0, %v1674_v0 }
  0xa0   :  { %1310 = vmatmul.mubr.bf16.gmra.mrb[36].mxu0 %v1459_v18 }
  0xa1   :  { %1313 = vmatprep.mubr.msk.bf16.mxu0 %vm1675_vm0, %v1674_v0 }
  0xa8   :  { %1314 = vmatmul.mubr.bf16.gmra.mrb[40].mxu0 %v1460_v19 }
  0xa9   :  { %1317 = vmatprep.mubr.msk.bf16.mxu0 %vm1675_vm0, %v1674_v0 }
  0xb0   :  { %1318 = vmatmul.mubr.bf16.gmra.mrb[44].mxu0 %v1461_v20 }
  0xb1   :  { %1321 = vmatprep.mubr.msk.bf16.mxu0 %vm1675_vm0, %v1674_v0 }
  0xb8   :  { %1322 = vmatmul.mubr.bf16.gmra.mrb[48].mxu0 %v1462_v23 }
  0xb9   :  { %1138 = vmatprep.mubr.f32.mxu0 %v1674_v0 }
 0x12b   :  { %v279_v31 = vpop.f32.mrb[0].mxu0 }
 0x12c   :  { %v1822_v32 = vadd.f32 %v1819_v30, %v279_v31  ;;  %v1275_v33 = vpop.f32.mrb[1].mxu0 }
 0x12d   :  { %v282_v34 = vpop.f32.mrb[2].mxu0 }
 0x12e   :  { %v382_v35 = vmul.f32 %v1822_v32, %v1822_v32  ;;  %v1827_v36 = vadd.f32 %v1819_v30, %v282_v34  ;;  %v1276_v37 = vpop.f32.mrb[3].mxu0 }
 0x130   :  { %v408_v38 = vmul.f32 %v382_v35, %v1822_v32  ;;  %v383_v39 = vmul.f32 %v1827_v36, %v1827_v36 }
 0x132   :  { %v434_v40 = vmul.f32 0.044715, %v408_v38  ;;  %v409_v41 = vmul.f32 %v383_v39, %v1827_v36 }
 0x133   :  { %v287_v42 = vpop.f32.mrb[4].mxu0 }
 0x134   :  { %v460_v43 = vadd.f32 %v434_v40, %v1822_v32  ;;  %v435_v44 = vmul.f32 0.044715, %v409_v41  ;;  %v1835_v45 = vadd.f32 %v1819_v30, %v287_v42  ;;  %v1279_v46 = vpop.f32.mrb[5].mxu0 }
 0x135   :  { %v290_v47 = vpop.f32.mrb[6].mxu0 }
 0x136   :  { %v486_v48 = vmul.f32 0.7978846, %v460_v43  ;;  %v461_v49 = vadd.f32 %v435_v44, %v1827_v36  ;;  %v384_v50 = vmul.f32 %v1835_v45, %v1835_v45  ;;  %v1841_v51 = vadd.f32 %v1819_v30, %v290_v47  ;;  %v1280_v52 = vpop.f32.mrb[7].mxu0 }
 0x138   :  { %1471 = vtanh.f32 %v486_v48  ;;  %v487_v53 = vmul.f32 0.7978846, %v461_v49  ;;  %v410_v54 = vmul.f32 %v384_v50, %v1835_v45  ;;  %v385_v55 = vmul.f32 %v1841_v51, %v1841_v51 }
 0x13a   :  { %1473 = vtanh.f32 %v487_v53  ;;  %v436_v56 = vmul.f32 0.044715, %v410_v54  ;;  %v411_v57 = vmul.f32 %v385_v55, %v1841_v51 }
 0x13b   :  { %v295_v58 = vpop.f32.mrb[8].mxu0 }
 0x13c   :  { %v462_v59 = vadd.f32 %v436_v56, %v1835_v45  ;;  %v437_v60 = vmul.f32 0.044715, %v411_v57  ;;  %v1849_v61 = vadd.f32 %v1819_v30, %v295_v58  ;;  %v1283_v62 = vpop.f32.mrb[9].mxu0 }
 0x13d   :  { %v298_v63 = vpop.f32.mrb[10].mxu0 }
 0x13e   :  { %v488_v1 = vmul.f32 0.7978846, %v462_v59  ;;  %v463_v2 = vadd.f32 %v437_v60, %v1841_v51  ;;  %v386_v3 = vmul.f32 %v1849_v61, %v1849_v61  ;;  %v1855_v4 = vadd.f32 %v1819_v30, %v298_v63  ;;  %v1284_v5 = vpop.f32.mrb[11].mxu0 }
 0x140   :  { %1475 = vtanh.f32 %v488_v1  ;;  %v489_v6 = vmul.f32 0.7978846, %v463_v2  ;;  %v412_v7 = vmul.f32 %v386_v3, %v1849_v61  ;;  %v387_v8 = vmul.f32 %v1855_v4, %v1855_v4 }
 0x142   :  { %v1472_v9 = vpop.eup %1471  ;;  %1477 = vtanh.f32 %v489_v6  ;;  %v438_v10 = vmul.f32 0.044715, %v412_v7  ;;  %v413_v11 = vmul.f32 %v387_v8, %v1855_v4 }
 0x143   :  { %v303_v12 = vpop.f32.mrb[12].mxu0  ;;  %v538_v13 = vadd.f32 1.0, %v1472_v9 }
 0x144   :  { %v1474_v14 = vpop.eup %1473  ;;  %v464_v15 = vadd.f32 %v438_v10, %v1849_v61  ;;  %v439_v16 = vmul.f32 0.044715, %v413_v11  ;;  %v1863_v17 = vadd.f32 %v1819_v30, %v303_v12  ;;  %v1287_v18 = vpop.f32.mrb[13].mxu0 }
 0x145   :  { %v306_v19 = vpop.f32.mrb[14].mxu0  ;;  %v539_v20 = vadd.f32 1.0, %v1474_v14  ;;  %v564_v21 = vmul.f32 0.5, %v538_v13 }
 0x146   :  { %v490_v22 = vmul.f32 0.7978846, %v464_v15  ;;  %v465_v23 = vadd.f32 %v439_v16, %v1855_v4  ;;  %v388_v24 = vmul.f32 %v1863_v17, %v1863_v17  ;;  %v1869_v25 = vadd.f32 %v1819_v30, %v306_v19  ;;  %v1288_v26 = vpop.f32.mrb[15].mxu0 }
 0x147   :  { %v565_v27 = vmul.f32 0.5, %v539_v20  ;;  %v590_v33 = vmul.f32 %v564_v21, %v1822_v32 }
 0x148   :  { %1479 = vtanh.f32 %v490_v22  ;;  %v491_v28 = vmul.f32 0.7978846, %v465_v23  ;;  %v414_v29 = vmul.f32 %v388_v24, %v1863_v17  ;;  %v389_v31 = vmul.f32 %v1869_v25, %v1869_v25 }
 0x149   :  { %v591_v34 = vmul.f32 %v565_v27, %v1827_v36 }
 0x14a   :  { %v1476_v35 = vpop.eup %1475  ;;  %1481 = vtanh.f32 %v491_v28  ;;  %v440_v37 = vmul.f32 0.044715, %v414_v29  ;;  %v415_v38 = vmul.f32 %v389_v31, %v1869_v25 }
 0x14b   :  { %v311_v39 = vpop.f32.mrb[16].mxu0  ;;  %v616_v40 = vpack.c.bf16 %v591_v34, %v590_v33  ;;  %v540_v41 = vadd.f32 1.0, %v1476_v35 }
 0x14c   :  { %v1478_v42 = vpop.eup %1477  ;;  %v466_v43 = vadd.f32 %v440_v37, %v1863_v17  ;;  %v441_v44 = vmul.f32 0.044715, %v415_v38  ;;  %v1879_v46 = vadd.f32 %v1819_v30, %v311_v39  ;;  %v1291_v47 = vpop.f32.mrb[17].mxu0 }
 0x14d   :  { %v314_v48 = vpop.f32.mrb[18].mxu0  ;;  %1342 = vmatmul.mubr.bf16.vlgmr.msra.gmra.mrb[0].mxu1 %v616_v40  ;;  %v541_v32 = vadd.f32 1.0, %v1478_v42  ;;  %v566_v36 = vmul.f32 0.5, %v540_v41 }
 0x14e   :  { %v492_v49 = vmul.f32 0.7978846, %v466_v43  ;;  %v467_v50 = vadd.f32 %v441_v44, %v1869_v25  ;;  %v390_v52 = vmul.f32 %v1879_v46, %v1879_v46  ;;  %v1885_v53 = vadd.f32 %v1819_v30, %v314_v48  ;;  %v1292_v54 = vpop.f32.mrb[19].mxu0  ;;  %1345 = vmatprep.mubr.msk.bf16.mxu1 %vm1675_vm0, %v1674_v0 }
 0x14f   :  { %v567_v55 = vmul.f32 0.5, %v541_v32  ;;  %v592_v59 = vmul.f32 %v566_v36, %v1835_v45 }
 0x150   :  { %1483 = vtanh.f32 %v492_v49  ;;  %v493_v56 = vmul.f32 0.7978846, %v467_v50  ;;  %v416_v57 = vmul.f32 %v390_v52, %v1879_v46  ;;  %v391_v58 = vmul.f32 %v1885_v53, %v1885_v53 }
 0x151   :  { %v593_v60 = vmul.f32 %v567_v55, %v1841_v51 }
 0x152   :  { %v1480_v62 = vpop.eup %1479  ;;  %1485 = vtanh.f32 %v493_v56  ;;  %v442_v63 = vmul.f32 0.044715, %v416_v57  ;;  %v417_v1 = vmul.f32 %v391_v58, %v1885_v53 }
 0x153   :  { %v319_v2 = vpop.f32.mrb[20].mxu0  ;;  %v617_v3 = vpack.c.bf16 %v593_v60, %v592_v59  ;;  %v542_v5 = vadd.f32 1.0, %v1480_v62 }
 0x154   :  { %v1482_v6 = vpop.eup %1481  ;;  %v468_v7 = vadd.f32 %v442_v63, %v1879_v46  ;;  %v443_v8 = vmul.f32 0.044715, %v417_v1  ;;  %v1897_v9 = vadd.f32 %v1819_v30, %v319_v2  ;;  %v1295_v10 = vpop.f32.mrb[21].mxu0 }
 0x155   :  { %v322_v11 = vpop.f32.mrb[22].mxu0  ;;  %1346 = vmatmul.mubr.bf16.gmra.mrb[4].mxu1 %v617_v3  ;;  %v543_v45 = vadd.f32 1.0, %v1482_v6  ;;  %v568_v51 = vmul.f32 0.5, %v542_v5 }
 0x156   :  { %v494_v12 = vmul.f32 0.7978846, %v468_v7  ;;  %v469_v13 = vadd.f32 %v443_v8, %v1885_v53  ;;  %v392_v14 = vmul.f32 %v1897_v9, %v1897_v9  ;;  %v1903_v15 = vadd.f32 %v1819_v30, %v322_v11  ;;  %v1296_v16 = vpop.f32.mrb[23].mxu0  ;;  %1349 = vmatprep.mubr.msk.bf16.mxu1 %vm1675_vm0, %v1674_v0 }
 0x157   :  { %v569_v18 = vmul.f32 0.5, %v543_v45  ;;  %v594_v22 = vmul.f32 %v568_v51, %v1849_v61 }
 0x158   :  { %1487 = vtanh.f32 %v494_v12  ;;  %v495_v19 = vmul.f32 0.7978846, %v469_v13  ;;  %v418_v20 = vmul.f32 %v392_v14, %v1897_v9  ;;  %v393_v21 = vmul.f32 %v1903_v15, %v1903_v15 }
 0x159   :  { %v595_v23 = vmul.f32 %v569_v18, %v1855_v4 }
 0x15a   :  { %v1484_v24 = vpop.eup %1483  ;;  %1489 = vtanh.f32 %v495_v19  ;;  %v444_v26 = vmul.f32 0.044715, %v418_v20  ;;  %v419_v27 = vmul.f32 %v393_v21, %v1903_v15 }
 0x15b   :  { %v327_v28 = vpop.f32.mrb[24].mxu0  ;;  %v618_v29 = vpack.c.bf16 %v595_v23, %v594_v22  ;;  %v544_v31 = vadd.f32 1.0, %v1484_v24 }
 0x15c   :  { %v1486_v33 = vpop.eup %1485  ;;  %v470_v34 = vadd.f32 %v444_v26, %v1897_v9  ;;  %v445_v35 = vmul.f32 0.044715, %v419_v27  ;;  %v1915_v37 = vadd.f32 %v1819_v30, %v327_v28  ;;  %v1299_v38 = vpop.f32.mrb[25].mxu0 }
 0x15d   :  { %v330_v39 = vpop.f32.mrb[26].mxu0  ;;  %1350 = vmatmul.mubr.bf16.gmra.mrb[8].mxu1 %v618_v29  ;;  %v545_v61 = vadd.f32 1.0, %v1486_v33  ;;  %v570_v4 = vmul.f32 0.5, %v544_v31 }
 0x15e   :  { %v496_v40 = vmul.f32 0.7978846, %v470_v34  ;;  %v471_v41 = vadd.f32 %v445_v35, %v1903_v15  ;;  %v394_v42 = vmul.f32 %v1915_v37, %v1915_v37  ;;  %v1921_v43 = vadd.f32 %v1819_v30, %v330_v39  ;;  %v1300_v44 = vpop.f32.mrb[27].mxu0  ;;  %1353 = vmatprep.mubr.msk.bf16.mxu1 %vm1675_vm0, %v1674_v0 }
 0x15f   :  { %v571_v47 = vmul.f32 0.5, %v545_v61  ;;  %v596_v49 = vmul.f32 %v570_v4, %v1863_v17 }
 0x160   :  { %1491 = vtanh.f32 %v496_v40  ;;  %v497_v48 = vmul.f32 0.7978846, %v471_v41  ;;  %v420_v32 = vmul.f32 %v394_v42, %v1915_v37  ;;  %v395_v36 = vmul.f32 %v1921_v43, %v1921_v43 }
 0x161   :  { %v597_v50 = vmul.f32 %v571_v47, %v1869_v25 }
 0x162   :  { %v1488_v52 = vpop.eup %1487  ;;  %1493 = vtanh.f32 %v497_v48  ;;  %v446_v54 = vmul.f32 0.044715, %v420_v32  ;;  %v421_v55 = vmul.f32 %v395_v36, %v1921_v43 }
 0x163   :  { %v335_v56 = vpop.f32.mrb[28].mxu0  ;;  %v619_v57 = vpack.c.bf16 %v597_v50, %v596_v49  ;;  %v546_v58 = vadd.f32 1.0, %v1488_v52 }
 0x164   :  { %v1490_v59 = vpop.eup %1489  ;;  %v472_v60 = vadd.f32 %v446_v54, %v1915_v37  ;;  %v447_v62 = vmul.f32 0.044715, %v421_v55  ;;  %v1933_v63 = vadd.f32 %v1819_v30, %v335_v56  ;;  %v1303_v1 = vpop.f32.mrb[29].mxu0 }
 0x165   :  { %v338_v2 = vpop.f32.mrb[30].mxu0  ;;  %1354 = vmatmul.mubr.bf16.gmra.mrb[12].mxu1 %v619_v57  ;;  %v547_v17 = vadd.f32 1.0, %v1490_v59  ;;  %v572_v25 = vmul.f32 0.5, %v546_v58 }
 0x166   :  { %v498_v3 = vmul.f32 0.7978846, %v472_v60  ;;  %v473_v5 = vadd.f32 %v447_v62, %v1921_v43  ;;  %v396_v6 = vmul.f32 %v1933_v63, %v1933_v63  ;;  %v1939_v7 = vadd.f32 %v1819_v30, %v338_v2  ;;  %v1304_v8 = vpop.f32.mrb[31].mxu0  ;;  %1357 = vmatprep.mubr.msk.bf16.mxu1 %vm1675_vm0, %v1674_v0 }
 0x167   :  { %v573_v10 = vmul.f32 0.5, %v547_v17  ;;  %v598_v12 = vmul.f32 %v572_v25, %v1879_v46 }
 0x168   :  { %1495 = vtanh.f32 %v498_v3  ;;  %v499_v11 = vmul.f32 0.7978846, %v473_v5  ;;  %v422_v45 = vmul.f32 %v396_v6, %v1933_v63  ;;  %v397_v51 = vmul.f32 %v1939_v7, %v1939_v7 }
 0x169   :  { %v599_v13 = vmul.f32 %v573_v10, %v1885_v53 }
 0x16a   :  { %v1492_v14 = vpop.eup %1491  ;;  %1497 = vtanh.f32 %v499_v11  ;;  %v448_v16 = vmul.f32 0.044715, %v422_v45  ;;  %v423_v18 = vmul.f32 %v397_v51, %v1939_v7 }
 0x16b   :  { %v343_v19 = vpop.f32.mrb[32].mxu0  ;;  %v620_v20 = vpack.c.bf16 %v599_v13, %v598_v12  ;;  %v548_v21 = vadd.f32 1.0, %v1492_v14 }
 0x16c   :  { %v1494_v22 = vpop.eup %1493  ;;  %v474_v23 = vadd.f32 %v448_v16, %v1933_v63  ;;  %v449_v24 = vmul.f32 0.044715, %v423_v18  ;;  %v1951_v26 = vadd.f32 %v1819_v30, %v343_v19  ;;  %v1307_v27 = vpop.f32.mrb[33].mxu0 }
 0x16d   :  { %v346_v28 = vpop.f32.mrb[34].mxu0  ;;  %1358 = vmatmul.mubr.bf16.gmra.mrb[16].mxu1 %v620_v20  ;;  %v549_v46 = vadd.f32 1.0, %v1494_v22  ;;  %v574_v53 = vmul.f32 0.5, %v548_v21 }
 0x16e   :  { %v500_v29 = vmul.f32 0.7978846, %v474_v23  ;;  %v475_v31 = vadd.f32 %v449_v24, %v1939_v7  ;;  %v398_v33 = vmul.f32 %v1951_v26, %v1951_v26  ;;  %v1957_v34 = vadd.f32 %v1819_v30, %v346_v28  ;;  %v1308_v35 = vpop.f32.mrb[35].mxu0  ;;  %1361 = vmatprep.mubr.msk.bf16.mxu1 %vm1675_vm0, %v1674_v0 }
 0x16f   :  { %v575_v38 = vmul.f32 0.5, %v549_v46  ;;  %v600_v40 = vmul.f32 %v574_v53, %v1897_v9 }
 0x170   :  { %1499 = vtanh.f32 %v500_v29  ;;  %v501_v39 = vmul.f32 0.7978846, %v475_v31  ;;  %v424_v61 = vmul.f32 %v398_v33, %v1951_v26  ;;  %v399_v4 = vmul.f32 %v1957_v34, %v1957_v34 }
 0x171   :  { %v601_v41 = vmul.f32 %v575_v38, %v1903_v15 }
 0x172   :  { %v1496_v42 = vpop.eup %1495  ;;  %1501 = vtanh.f32 %v501_v39  ;;  %v450_v44 = vmul.f32 0.044715, %v424_v61  ;;  %v425_v47 = vmul.f32 %v399_v4, %v1957_v34 }
 0x173   :  { %v351_v48 = vpop.f32.mrb[36].mxu0  ;;  %v621_v32 = vpack.c.bf16 %v601_v41, %v600_v40  ;;  %v550_v36 = vadd.f32 1.0, %v1496_v42 }
 0x174   :  { %v1498_v49 = vpop.eup %1497  ;;  %v476_v50 = vadd.f32 %v450_v44, %v1951_v26  ;;  %v451_v52 = vmul.f32 0.044715, %v425_v47  ;;  %v1969_v54 = vadd.f32 %v1819_v30, %v351_v48  ;;  %v1311_v55 = vpop.f32.mrb[37].mxu0 }
 0x175   :  { %v354_v56 = vpop.f32.mrb[38].mxu0  ;;  %1362 = vmatmul.mubr.bf16.gmra.mrb[20].mxu1 %v621_v32  ;;  %v551_v9 = vadd.f32 1.0, %v1498_v49  ;;  %v576_v15 = vmul.f32 0.5, %v550_v36 }
 0x176   :  { %v502_v57 = vmul.f32 0.7978846, %v476_v50  ;;  %v477_v58 = vadd.f32 %v451_v52, %v1957_v34  ;;  %v400_v59 = vmul.f32 %v1969_v54, %v1969_v54  ;;  %v1975_v60 = vadd.f32 %v1819_v30, %v354_v56  ;;  %v1312_v62 = vpop.f32.mrb[39].mxu0  ;;  %1365 = vmatprep.mubr.msk.bf16.mxu1 %vm1675_vm0, %v1674_v0 }
 0x177   :  { %v577_v1 = vmul.f32 0.5, %v551_v9  ;;  %v602_v3 = vmul.f32 %v576_v15, %v1915_v37 }
 0x178   :  { %1503 = vtanh.f32 %v502_v57  ;;  %v503_v2 = vmul.f32 0.7978846, %v477_v58  ;;  %v426_v17 = vmul.f32 %v400_v59, %v1969_v54  ;;  %v401_v25 = vmul.f32 %v1975_v60, %v1975_v60 }
 0x179   :  { %v603_v5 = vmul.f32 %v577_v1, %v1921_v43 }
 0x17a   :  { %v1500_v6 = vpop.eup %1499  ;;  %1505 = vtanh.f32 %v503_v2  ;;  %v452_v8 = vmul.f32 0.044715, %v426_v17  ;;  %v427_v10 = vmul.f32 %v401_v25, %v1975_v60 }
 0x17b   :  { %v359_v11 = vpop.f32.mrb[40].mxu0  ;;  %v622_v45 = vpack.c.bf16 %v603_v5, %v602_v3  ;;  %v552_v51 = vadd.f32 1.0, %v1500_v6 }
 0x17c   :  { %v1502_v12 = vpop.eup %1501  ;;  %v478_v13 = vadd.f32 %v452_v8, %v1969_v54  ;;  %v453_v14 = vmul.f32 0.044715, %v427_v10  ;;  %v1987_v16 = vadd.f32 %v1819_v30, %v359_v11  ;;  %v1315_v18 = vpop.f32.mrb[41].mxu0 }
 0x17d   :  { %v362_v19 = vpop.f32.mrb[42].mxu0  ;;  %1366 = vmatmul.mubr.bf16.gmra.mrb[24].mxu1 %v622_v45  ;;  %v553_v37 = vadd.f32 1.0, %v1502_v12  ;;  %v578_v43 = vmul.f32 0.5, %v552_v51 }
 0x17e   :  { %v504_v20 = vmul.f32 0.7978846, %v478_v13  ;;  %v479_v21 = vadd.f32 %v453_v14, %v1975_v60  ;;  %v402_v22 = vmul.f32 %v1987_v16, %v1987_v16  ;;  %v1993_v23 = vadd.f32 %v1819_v30, %v362_v19  ;;  %v1316_v24 = vpop.f32.mrb[43].mxu0  ;;  %1369 = vmatprep.mubr.msk.bf16.mxu1 %vm1675_vm0, %v1674_v0 }
 0x17f   :  { %v579_v27 = vmul.f32 0.5, %v553_v37  ;;  %v604_v29 = vmul.f32 %v578_v43, %v1933_v63 }
 0x180   :  { %1507 = vtanh.f32 %v504_v20  ;;  %v505_v28 = vmul.f32 0.7978846, %v479_v21  ;;  %v428_v46 = vmul.f32 %v402_v22, %v1987_v16  ;;  %v403_v53 = vmul.f32 %v1993_v23, %v1993_v23 }
 0x181   :  { %v605_v31 = vmul.f32 %v579_v27, %v1939_v7 }
 0x182   :  { %v1504_v33 = vpop.eup %1503  ;;  %1509 = vtanh.f32 %v505_v28  ;;  %v454_v35 = vmul.f32 0.044715, %v428_v46  ;;  %v429_v38 = vmul.f32 %v403_v53, %v1993_v23 }
 0x183   :  { %v367_v39 = vpop.f32.mrb[44].mxu0  ;;  %v623_v61 = vpack.c.bf16 %v605_v31, %v604_v29  ;;  %v554_v4 = vadd.f32 1.0, %v1504_v33 }
 0x184   :  { %v1506_v40 = vpop.eup %1505  ;;  %v480_v41 = vadd.f32 %v454_v35, %v1987_v16  ;;  %v455_v42 = vmul.f32 0.044715, %v429_v38  ;;  %v2005_v44 = vadd.f32 %v1819_v30, %v367_v39  ;;  %v1319_v47 = vpop.f32.mrb[45].mxu0 }
 0x185   :  { %v370_v48 = vpop.f32.mrb[46].mxu0  ;;  %1370 = vmatmul.mubr.bf16.gmra.mrb[28].mxu1 %v623_v61  ;;  %v555_v63 = vadd.f32 1.0, %v1506_v40  ;;  %v580_v7 = vmul.f32 0.5, %v554_v4 }
 0x186   :  { %v506_v32 = vmul.f32 0.7978846, %v480_v41  ;;  %v481_v36 = vadd.f32 %v455_v42, %v1993_v23  ;;  %v404_v49 = vmul.f32 %v2005_v44, %v2005_v44  ;;  %v2011_v50 = vadd.f32 %v1819_v30, %v370_v48  ;;  %v1320_v52 = vpop.f32.mrb[47].mxu0  ;;  %1373 = vmatprep.mubr.msk.bf16.mxu1 %vm1675_vm0, %v1674_v0 }
 0x187   :  { %v581_v55 = vmul.f32 0.5, %v555_v63  ;;  %v606_v57 = vmul.f32 %v580_v7, %v1951_v26 }
 0x188   :  { %1511 = vtanh.f32 %v506_v32  ;;  %v507_v56 = vmul.f32 0.7978846, %v481_v36  ;;  %v430_v9 = vmul.f32 %v404_v49, %v2005_v44  ;;  %v405_v15 = vmul.f32 %v2011_v50, %v2011_v50 }
 0x189   :  { %v607_v58 = vmul.f32 %v581_v55, %v1957_v34 }
 0x18a   :  { %v1508_v59 = vpop.eup %1507  ;;  %1513 = vtanh.f32 %v507_v56  ;;  %v456_v62 = vmul.f32 0.044715, %v430_v9  ;;  %v431_v1 = vmul.f32 %v405_v15, %v2011_v50 }
 0x18b   :  { %v375_v2 = vpop.f32.mrb[48].mxu0  ;;  %v624_v17 = vpack.c.bf16 %v607_v58, %v606_v57  ;;  %v556_v25 = vadd.f32 1.0, %v1508_v59  ;;  %v1676_v58 = vmov 0.0|0.0  }
 0x18c   :  { %v1510_v3 = vpop.eup %1509  ;;  %v482_v5 = vadd.f32 %v456_v62, %v2005_v44  ;;  %v457_v6 = vmul.f32 0.044715, %v431_v1  ;;  %v376_v8 = vadd.f32 %v1819_v30, %v375_v2  ;;  %v1323_v10 = vpop.f32.mrb[49].mxu0  ;;  %1393 = vmatprep.subr.bf16.mxu0 %v1676_v58 }
 0x18d   :  { %v378_v11 = vpop.f32.mrb[50].mxu0  ;;  %1374 = vmatmul.mubr.bf16.gmra.mrb[32].mxu1 %v624_v17  ;;  %v557_v26 = vadd.f32 1.0, %v1510_v3  ;;  %v582_v45 = vmul.f32 0.5, %v556_v25 }
 0x18e   :  { %v508_v34 = vmul.f32 0.7978846, %v482_v5  ;;  %v483_v51 = vadd.f32 %v457_v6, %v2011_v50  ;;  %v406_v12 = vmul.f32 %v376_v8, %v376_v8  ;;  %v379_v13 = vadd.f32 %v1819_v30, %v378_v11  ;;  %v1324_v14 = vpop.f32.mrb[51].mxu0  ;;  %1377 = vmatprep.mubr.msk.bf16.mxu1 %vm1675_vm0, %v1674_v0 }
 0x18f   :  { %v583_v18 = vmul.f32 0.5, %v557_v26  ;;  %v608_v20 = vmul.f32 %v582_v45, %v1969_v54 }
 0x190   :  { %1515 = vtanh.f32 %v508_v34  ;;  %v509_v19 = vmul.f32 0.7978846, %v483_v51  ;;  %v432_v37 = vmul.f32 %v406_v12, %v376_v8  ;;  %v407_v43 = vmul.f32 %v379_v13, %v379_v13 }
 0x191   :  { %v609_v21 = vmul.f32 %v583_v18, %v1975_v60 }
 0x192   :  { %v1512_v22 = vpop.eup %1511  ;;  %1517 = vtanh.f32 %v509_v19  ;;  %v458_v24 = vmul.f32 0.044715, %v432_v37  ;;  %v433_v27 = vmul.f32 %v407_v43, %v379_v13 }
 0x193   :  { %v625_v28 = vpack.c.bf16 %v609_v21, %v608_v20  ;;  %v558_v46 = vadd.f32 1.0, %v1512_v22 }
 0x194   :  { %v1514_v30 = vpop.eup %1513  ;;  %v484_v53 = vadd.f32 %v458_v24, %v376_v8  ;;  %v459_v29 = vmul.f32 0.044715, %v433_v27 }
 0x195   :  { %1378 = vmatmul.mubr.bf16.gmra.mrb[36].mxu1 %v625_v28  ;;  %v559_v31 = vadd.f32 1.0, %v1514_v30  ;;  %v584_v33 = vmul.f32 0.5, %v558_v46 }
 0x196   :  { %v510_v35 = vmul.f32 0.7978846, %v484_v53  ;;  %v485_v38 = vadd.f32 %v459_v29, %v379_v13  ;;  %1381 = vmatprep.mubr.msk.bf16.mxu1 %vm1675_vm0, %v1674_v0 }
 0x197   :  { %v585_v54 = vmul.f32 0.5, %v559_v31  ;;  %v610_v39 = vmul.f32 %v584_v33, %v1987_v16 }
 0x198   :  { %1519 = vtanh.f32 %v510_v35  ;;  %v511_v60 = vmul.f32 0.7978846, %v485_v38 }
 0x199   :  { %v611_v61 = vmul.f32 %v585_v54, %v1993_v23 }
 0x19a   :  { %v1516_v4 = vpop.eup %1515  ;;  %1521 = vtanh.f32 %v511_v60 }
 0x19b   :  { %v626_v40 = vpack.c.bf16 %v611_v61, %v610_v39  ;;  %v560_v41 = vadd.f32 1.0, %v1516_v4 }
 0x19c   :  { %v1518_v42 = vpop.eup %1517 }
 0x19d   :  { %1382 = vmatmul.mubr.bf16.gmra.mrb[40].mxu1 %v626_v40  ;;  %v561_v47 = vadd.f32 1.0, %v1518_v42  ;;  %v586_v48 = vmul.f32 0.5, %v560_v41 }
 0x19e   :  { %1385 = vmatprep.mubr.msk.bf16.mxu1 %vm1675_vm0, %v1674_v0 }
 0x19f   :  { %v587_v63 = vmul.f32 0.5, %v561_v47  ;;  %v612_v7 = vmul.f32 %v586_v48, %v2005_v44  ;;  %v2043_v44 = vld [vmem:[%s2273_s4] ss:$0 sm:$0xff] }
 0x1a1   :  { %v613_v32 = vmul.f32 %v587_v63, %v2011_v50 }
 0x1a2   :  { %v1520_v36 = vpop.eup %1519 }
 0x1a3   :  { %v627_v16 = vpack.c.bf16 %v613_v32, %v612_v7  ;;  %v562_v49 = vadd.f32 1.0, %v1520_v36 }
 0x1a4   :  { %v1522_v23 = vpop.eup %1521 }
 0x1a5   :  { %1386 = vmatmul.mubr.bf16.gmra.mrb[44].mxu1 %v627_v16  ;;  %v563_v52 = vadd.f32 1.0, %v1522_v23  ;;  %v588_v55 = vmul.f32 0.5, %v562_v49 }
 0x1a6   :  { %1389 = vmatprep.mubr.msk.bf16.mxu1 %vm1675_vm0, %v1674_v0 }
 0x1a7   :  { %v589_v56 = vmul.f32 0.5, %v563_v52  ;;  %v614_v9 = vmul.f32 %v588_v55, %v376_v8 }
 0x1a9   :  { %v615_v15 = vmul.f32 %v589_v56, %v379_v13 }
 0x1ab   :  { %v628_v57 = vpack.c.bf16 %v615_v15, %v614_v9 }
 0x1ad   :  { %1390 = vmatmul.mubr.bf16.gmra.mrb[48].mxu1 %v628_v57 }
 0x220   :  { %v734_v50 = vpop.f32.mrb[0].mxu1 }
 0x221   :  { %v2046_v59 = vadd.f32 %v2043_v44, %v734_v50  ;;  %v1343_v62 = vpop.f32.mrb[1].mxu1 }
 0x222   :  { %v737_v1 = vpop.f32.mrb[2].mxu1 }
 0x223   :  { %v837_v0 = vmul.f32 %v2046_v59, %v2046_v59  ;;  %v2051_v2 = vadd.f32 %v2043_v44, %v737_v1  ;;  %v1344_v17 = vpop.f32.mrb[3].mxu1 }
 0x225   :  { %v863_v25 = vmul.f32 %v837_v0, %v2046_v59  ;;  %v838_v3 = vmul.f32 %v2051_v2, %v2051_v2 }
 0x227   :  { %v889_v5 = vmul.f32 0.044715, %v863_v25  ;;  %v864_v6 = vmul.f32 %v838_v3, %v2051_v2 }
 0x228   :  { %v742_v8 = vpop.f32.mrb[4].mxu1 }
 0x229   :  { %v915_v10 = vadd.f32 %v889_v5, %v2046_v59  ;;  %v890_v11 = vmul.f32 0.044715, %v864_v6  ;;  %v2059_v26 = vadd.f32 %v2043_v44, %v742_v8  ;;  %v1347_v45 = vpop.f32.mrb[5].mxu1 }
 0x22a   :  { %v745_v34 = vpop.f32.mrb[6].mxu1 }
 0x22b   :  { %v941_v51 = vmul.f32 0.7978846, %v915_v10  ;;  %v916_v12 = vadd.f32 %v890_v11, %v2051_v2  ;;  %v839_v13 = vmul.f32 %v2059_v26, %v2059_v26  ;;  %v2065_v14 = vadd.f32 %v2043_v44, %v745_v34  ;;  %v1348_v18 = vpop.f32.mrb[7].mxu1 }
 0x22d   :  { %1523 = vtanh.f32 %v941_v51  ;;  %v942_v19 = vmul.f32 0.7978846, %v916_v12  ;;  %v865_v37 = vmul.f32 %v839_v13, %v2059_v26  ;;  %v840_v43 = vmul.f32 %v2065_v14, %v2065_v14 }
 0x22f   :  { %1525 = vtanh.f32 %v942_v19  ;;  %v891_v20 = vmul.f32 0.044715, %v865_v37  ;;  %v866_v21 = vmul.f32 %v840_v43, %v2065_v14 }
 0x230   :  { %v750_v22 = vpop.f32.mrb[8].mxu1 }
 0x231   :  { %v917_v24 = vadd.f32 %v891_v20, %v2059_v26  ;;  %v892_v27 = vmul.f32 0.044715, %v866_v21  ;;  %v2073_v28 = vadd.f32 %v2043_v44, %v750_v22  ;;  %v1351_v46 = vpop.f32.mrb[9].mxu1 }
 0x232   :  { %v753_v30 = vpop.f32.mrb[10].mxu1 }
 0x233   :  { %v943_v53 = vmul.f32 0.7978846, %v917_v24  ;;  %v918_v29 = vadd.f32 %v892_v27, %v2065_v14  ;;  %v841_v31 = vmul.f32 %v2073_v28, %v2073_v28  ;;  %v2079_v33 = vadd.f32 %v2043_v44, %v753_v30  ;;  %v1352_v35 = vpop.f32.mrb[11].mxu1 }
 0x235   :  { %1527 = vtanh.f32 %v943_v53  ;;  %v944_v38 = vmul.f32 0.7978846, %v918_v29  ;;  %v867_v54 = vmul.f32 %v841_v31, %v2073_v28  ;;  %v842_v60 = vmul.f32 %v2079_v33, %v2079_v33 }
 0x237   :  { %v1524_v39 = vpop.eup %1523  ;;  %1529 = vtanh.f32 %v944_v38  ;;  %v893_v61 = vmul.f32 0.044715, %v867_v54  ;;  %v868_v4 = vmul.f32 %v842_v60, %v2079_v33 }
 0x238   :  { %v993_v40 = vadd.f32 1.0, %v1524_v39  ;;  %v758_v41 = vpop.f32.mrb[12].mxu1 }
 0x239   :  { %v1526_v42 = vpop.eup %1525  ;;  %v919_v47 = vadd.f32 %v893_v61, %v2073_v28  ;;  %v894_v48 = vmul.f32 0.044715, %v868_v4  ;;  %v2087_v63 = vadd.f32 %v2043_v44, %v758_v41  ;;  %v1355_v7 = vpop.f32.mrb[13].mxu1 }
 0x23a   :  { %v1019_v32 = vmul.f32 0.5, %v993_v40  ;;  %v994_v36 = vadd.f32 1.0, %v1526_v42  ;;  %v761_v16 = vpop.f32.mrb[14].mxu1 }
 0x23b   :  { %v945_v49 = vmul.f32 0.7978846, %v919_v47  ;;  %v920_v23 = vadd.f32 %v894_v48, %v2079_v33  ;;  %v843_v52 = vmul.f32 %v2087_v63, %v2087_v63  ;;  %v2093_v55 = vadd.f32 %v2043_v44, %v761_v16  ;;  %v1356_v56 = vpop.f32.mrb[15].mxu1 }
 0x23c   :  { %v1020_v9 = vmul.f32 0.5, %v994_v36  ;;  %v1045_v62 = vmul.f32 %v1019_v32, %v2046_v59 }
 0x23d   :  { %1531 = vtanh.f32 %v945_v49  ;;  %v946_v15 = vmul.f32 0.7978846, %v920_v23  ;;  %v869_v57 = vmul.f32 %v843_v52, %v2087_v63  ;;  %v844_v50 = vmul.f32 %v2093_v55, %v2093_v55 }
 0x23e   :  { %v1046_v1 = vmul.f32 %v1020_v9, %v2051_v2 }
 0x23f   :  { %v1528_v0 = vpop.eup %1527  ;;  %1533 = vtanh.f32 %v946_v15  ;;  %v895_v17 = vmul.f32 0.044715, %v869_v57  ;;  %v870_v25 = vmul.f32 %v844_v50, %v2093_v55 }
 0x240   :  { %v995_v3 = vadd.f32 1.0, %v1528_v0  ;;  %v766_v5 = vpop.f32.mrb[16].mxu1  ;;  %v1394_v6 = vpack.c.bf16 %v1046_v1, %v1045_v62 }
 0x241   :  { %v1530_v8 = vpop.eup %1529  ;;  %v921_v10 = vadd.f32 %v895_v17, %v2087_v63  ;;  %v896_v11 = vmul.f32 0.044715, %v870_v25  ;;  %v2103_v45 = vadd.f32 %v2043_v44, %v766_v5  ;;  %v1359_v34 = vpop.f32.mrb[17].mxu1 }
 0x242   :  { %v1021_v51 = vmul.f32 0.5, %v995_v3  ;;  %v996_v59 = vadd.f32 1.0, %v1530_v8  ;;  %v769_v12 = vpop.f32.mrb[18].mxu1  ;;  %1395 = vmatpush1.bf16.xpose.msra.mxu0 %v1394_v6 }
 0x243   :  { %v947_v2 = vmul.f32 0.7978846, %v921_v10  ;;  %v922_v13 = vadd.f32 %v896_v11, %v2093_v55  ;;  %v845_v18 = vmul.f32 %v2103_v45, %v2103_v45  ;;  %v2109_v19 = vadd.f32 %v2043_v44, %v769_v12  ;;  %v1360_v37 = vpop.f32.mrb[19].mxu1  ;;  %1396 = vmatprep.subr.bf16.mxu0 %v1676_v58 }
 0x244   :  { %v1022_v43 = vmul.f32 0.5, %v996_v59  ;;  %v1047_v24 = vmul.f32 %v1021_v51, %v2059_v26 }
 0x245   :  { %1535 = vtanh.f32 %v947_v2  ;;  %v948_v20 = vmul.f32 0.7978846, %v922_v13  ;;  %v871_v21 = vmul.f32 %v845_v18, %v2103_v45  ;;  %v846_v22 = vmul.f32 %v2109_v19, %v2109_v19 }
 0x246   :  { %v1048_v27 = vmul.f32 %v1022_v43, %v2065_v14 }
 0x247   :  { %v1532_v46 = vpop.eup %1531  ;;  %1537 = vtanh.f32 %v948_v20  ;;  %v897_v30 = vmul.f32 0.044715, %v871_v21  ;;  %v872_v53 = vmul.f32 %v846_v22, %v2109_v19 }
 0x248   :  { %v997_v29 = vadd.f32 1.0, %v1532_v46  ;;  %v774_v31 = vpop.f32.mrb[20].mxu1  ;;  %v1397_v35 = vpack.c.bf16 %v1048_v27, %v1047_v24 }
 0x249   :  { %v1534_v38 = vpop.eup %1533  ;;  %v923_v54 = vadd.f32 %v897_v30, %v2103_v45  ;;  %v898_v60 = vmul.f32 0.044715, %v872_v53  ;;  %v2120_v39 = vadd.f32 %v2043_v44, %v774_v31  ;;  %v1363_v61 = vpop.f32.mrb[21].mxu1 }
 0x24a   :  { %v1023_v4 = vmul.f32 0.5, %v997_v29  ;;  %v998_v26 = vadd.f32 1.0, %v1534_v38  ;;  %v777_v40 = vpop.f32.mrb[22].mxu1  ;;  %1398 = vmatpush1.bf16.xpose.msra.mxu0 %v1397_v35 }
 0x24b   :  { %v949_v14 = vmul.f32 0.7978846, %v923_v54  ;;  %v924_v41 = vadd.f32 %v898_v60, %v2109_v19  ;;  %v847_v42 = vmul.f32 %v2120_v39, %v2120_v39  ;;  %v2126_v47 = vadd.f32 %v2043_v44, %v777_v40  ;;  %v1364_v48 = vpop.f32.mrb[23].mxu1  ;;  %1399 = vmatprep.subr.bf16.mxu0 %v1676_v58 }
 0x24c   :  { %v1024_v7 = vmul.f32 0.5, %v998_v26  ;;  %v1049_v49 = vmul.f32 %v1023_v4, %v2073_v28 }
 0x24d   :  { %1539 = vtanh.f32 %v949_v14  ;;  %v950_v32 = vmul.f32 0.7978846, %v924_v41  ;;  %v873_v36 = vmul.f32 %v847_v42, %v2120_v39  ;;  %v848_v16 = vmul.f32 %v2126_v47, %v2126_v47 }
 0x24e   :  { %v1050_v23 = vmul.f32 %v1024_v7, %v2079_v33 }
 0x24f   :  { %v1536_v52 = vpop.eup %1535  ;;  %1541 = vtanh.f32 %v950_v32  ;;  %v899_v56 = vmul.f32 0.044715, %v873_v36  ;;  %v874_v9 = vmul.f32 %v848_v16, %v2126_v47 }
 0x250   :  { %v999_v15 = vadd.f32 1.0, %v1536_v52  ;;  %v782_v57 = vpop.f32.mrb[24].mxu1  ;;  %v1400_v50 = vpack.c.bf16 %v1050_v23, %v1049_v49 }
 0x251   :  { %v1538_v62 = vpop.eup %1537  ;;  %v925_v1 = vadd.f32 %v899_v56, %v2120_v39  ;;  %v900_v0 = vmul.f32 0.044715, %v874_v9  ;;  %v2137_v17 = vadd.f32 %v2043_v44, %v782_v57  ;;  %v1367_v25 = vpop.f32.mrb[25].mxu1 }
 0x252   :  { %v1025_v3 = vmul.f32 0.5, %v999_v15  ;;  %v1000_v28 = vadd.f32 1.0, %v1538_v62  ;;  %v785_v5 = vpop.f32.mrb[26].mxu1  ;;  %1401 = vmatpush1.bf16.xpose.msra.mxu0 %v1400_v50 }
 0x253   :  { %v951_v33 = vmul.f32 0.7978846, %v925_v1  ;;  %v926_v6 = vadd.f32 %v900_v0, %v2126_v47  ;;  %v849_v8 = vmul.f32 %v2137_v17, %v2137_v17  ;;  %v2143_v10 = vadd.f32 %v2043_v44, %v785_v5  ;;  %v1368_v11 = vpop.f32.mrb[27].mxu1  ;;  %1402 = vmatprep.subr.bf16.mxu0 %v1676_v58 }
 0x254   :  { %v1026_v34 = vmul.f32 0.5, %v1000_v28  ;;  %v1051_v2 = vmul.f32 %v1025_v3, %v2087_v63 }
 0x255   :  { %1543 = vtanh.f32 %v951_v33  ;;  %v952_v51 = vmul.f32 0.7978846, %v926_v6  ;;  %v875_v59 = vmul.f32 %v849_v8, %v2137_v17  ;;  %v850_v12 = vmul.f32 %v2143_v10, %v2143_v10 }
 0x256   :  { %v1052_v13 = vmul.f32 %v1026_v34, %v2093_v55 }
 0x257   :  { %v1540_v18 = vpop.eup %1539  ;;  %1545 = vtanh.f32 %v952_v51  ;;  %v901_v37 = vmul.f32 0.044715, %v875_v59  ;;  %v876_v43 = vmul.f32 %v850_v12, %v2143_v10 }
 0x258   :  { %v1001_v20 = vadd.f32 1.0, %v1540_v18  ;;  %v790_v21 = vpop.f32.mrb[28].mxu1  ;;  %v1403_v22 = vpack.c.bf16 %v1052_v13, %v1051_v2 }
 0x259   :  { %v1542_v24 = vpop.eup %1541  ;;  %v927_v27 = vadd.f32 %v901_v37, %v2137_v17  ;;  %v902_v46 = vmul.f32 0.044715, %v876_v43  ;;  %v2154_v30 = vadd.f32 %v2043_v44, %v790_v21  ;;  %v1371_v53 = vpop.f32.mrb[29].mxu1 }
 0x25a   :  { %v1027_v29 = vmul.f32 0.5, %v1001_v20  ;;  %v1002_v63 = vadd.f32 1.0, %v1542_v24  ;;  %v793_v31 = vpop.f32.mrb[30].mxu1  ;;  %1404 = vmatpush1.bf16.xpose.msra.mxu0 %v1403_v22 }
 0x25b   :  { %v953_v55 = vmul.f32 0.7978846, %v927_v27  ;;  %v928_v35 = vadd.f32 %v902_v46, %v2143_v10  ;;  %v851_v38 = vmul.f32 %v2154_v30, %v2154_v30  ;;  %v2160_v54 = vadd.f32 %v2043_v44, %v793_v31  ;;  %v1372_v60 = vpop.f32.mrb[31].mxu1  ;;  %1405 = vmatprep.subr.bf16.mxu0 %v1676_v58 }
 0x25c   :  { %v1028_v61 = vmul.f32 0.5, %v1002_v63  ;;  %v1053_v14 = vmul.f32 %v1027_v29, %v2103_v45 }
 0x25d   :  { %1547 = vtanh.f32 %v953_v55  ;;  %v954_v4 = vmul.f32 0.7978846, %v928_v35  ;;  %v877_v26 = vmul.f32 %v851_v38, %v2154_v30  ;;  %v852_v40 = vmul.f32 %v2160_v54, %v2160_v54 }
 0x25e   :  { %v1054_v41 = vmul.f32 %v1028_v61, %v2109_v19 }
 0x25f   :  { %v1544_v42 = vpop.eup %1543  ;;  %1549 = vtanh.f32 %v954_v4  ;;  %v903_v48 = vmul.f32 0.044715, %v877_v26  ;;  %v878_v7 = vmul.f32 %v852_v40, %v2160_v54 }
 0x260   :  { %v1003_v32 = vadd.f32 1.0, %v1544_v42  ;;  %v798_v36 = vpop.f32.mrb[32].mxu1  ;;  %v1406_v16 = vpack.c.bf16 %v1054_v41, %v1053_v14 }
 0x261   :  { %v1546_v49 = vpop.eup %1545  ;;  %v929_v23 = vadd.f32 %v903_v48, %v2154_v30  ;;  %v904_v52 = vmul.f32 0.044715, %v878_v7  ;;  %v2171_v56 = vadd.f32 %v2043_v44, %v798_v36  ;;  %v1375_v9 = vpop.f32.mrb[33].mxu1 }
 0x262   :  { %v1029_v15 = vmul.f32 0.5, %v1003_v32  ;;  %v1004_v45 = vadd.f32 1.0, %v1546_v49  ;;  %v801_v57 = vpop.f32.mrb[34].mxu1  ;;  %1407 = vmatpush1.bf16.xpose.msra.mxu0 %v1406_v16 }
 0x263   :  { %v955_v19 = vmul.f32 0.7978846, %v929_v23  ;;  %v930_v50 = vadd.f32 %v904_v52, %v2160_v54  ;;  %v853_v62 = vmul.f32 %v2171_v56, %v2171_v56  ;;  %v2177_v1 = vadd.f32 %v2043_v44, %v801_v57  ;;  %v1376_v0 = vpop.f32.mrb[35].mxu1  ;;  %1408 = vmatprep.subr.bf16.mxu0 %v1676_v58 }
 0x264   :  { %v1030_v25 = vmul.f32 0.5, %v1004_v45  ;;  %v1055_v33 = vmul.f32 %v1029_v15, %v2120_v39 }
 0x265   :  { %1551 = vtanh.f32 %v955_v19  ;;  %v956_v3 = vmul.f32 0.7978846, %v930_v50  ;;  %v879_v28 = vmul.f32 %v853_v62, %v2171_v56  ;;  %v854_v5 = vmul.f32 %v2177_v1, %v2177_v1 }
 0x266   :  { %v1056_v6 = vmul.f32 %v1030_v25, %v2126_v47 }
 0x267   :  { %v1548_v8 = vpop.eup %1547  ;;  %1553 = vtanh.f32 %v956_v3  ;;  %v905_v11 = vmul.f32 0.044715, %v879_v28  ;;  %v880_v34 = vmul.f32 %v854_v5, %v2177_v1 }
 0x268   :  { %v1005_v51 = vadd.f32 1.0, %v1548_v8  ;;  %v806_v59 = vpop.f32.mrb[36].mxu1  ;;  %v1409_v12 = vpack.c.bf16 %v1056_v6, %v1055_v33 }
 0x269   :  { %v1550_v2 = vpop.eup %1549  ;;  %v931_v13 = vadd.f32 %v905_v11, %v2171_v56  ;;  %v906_v18 = vmul.f32 0.044715, %v880_v34  ;;  %v2188_v37 = vadd.f32 %v2043_v44, %v806_v59  ;;  %v1379_v43 = vpop.f32.mrb[37].mxu1 }
 0x26a   :  { %v1031_v20 = vmul.f32 0.5, %v1005_v51  ;;  %v1006_v39 = vadd.f32 1.0, %v1550_v2  ;;  %v809_v21 = vpop.f32.mrb[38].mxu1  ;;  %1410 = vmatpush1.bf16.xpose.msra.mxu0 %v1409_v12 }
 0x26b   :  { %v957_v47 = vmul.f32 0.7978846, %v931_v13  ;;  %v932_v22 = vadd.f32 %v906_v18, %v2177_v1  ;;  %v855_v24 = vmul.f32 %v2188_v37, %v2188_v37  ;;  %v2194_v27 = vadd.f32 %v2043_v44, %v809_v21  ;;  %v1380_v46 = vpop.f32.mrb[39].mxu1  ;;  %1411 = vmatprep.subr.bf16.mxu0 %v1676_v58 }
 0x26c   :  { %v1032_v53 = vmul.f32 0.5, %v1006_v39  ;;  %v1057_v55 = vmul.f32 %v1031_v20, %v2137_v17 }
 0x26d   :  { %1555 = vtanh.f32 %v957_v47  ;;  %v958_v29 = vmul.f32 0.7978846, %v932_v22  ;;  %v881_v63 = vmul.f32 %v855_v24, %v2188_v37  ;;  %v856_v31 = vmul.f32 %v2194_v27, %v2194_v27 }
 0x26e   :  { %v1058_v35 = vmul.f32 %v1032_v53, %v2143_v10 }
 0x26f   :  { %v1552_v38 = vpop.eup %1551  ;;  %1557 = vtanh.f32 %v958_v29  ;;  %v907_v60 = vmul.f32 0.044715, %v881_v63  ;;  %v882_v61 = vmul.f32 %v856_v31, %v2194_v27 }
 0x270   :  { %v1007_v4 = vadd.f32 1.0, %v1552_v38  ;;  %v814_v26 = vpop.f32.mrb[40].mxu1  ;;  %v1412_v40 = vpack.c.bf16 %v1058_v35, %v1057_v55 }
 0x271   :  { %v1554_v14 = vpop.eup %1553  ;;  %v933_v41 = vadd.f32 %v907_v60, %v2188_v37  ;;  %v908_v42 = vmul.f32 0.044715, %v882_v61  ;;  %v2205_v48 = vadd.f32 %v2043_v44, %v814_v26  ;;  %v1383_v7 = vpop.f32.mrb[41].mxu1 }
 0x272   :  { %v1033_v32 = vmul.f32 0.5, %v1007_v4  ;;  %v1008_v17 = vadd.f32 1.0, %v1554_v14  ;;  %v817_v36 = vpop.f32.mrb[42].mxu1  ;;  %1413 = vmatpush1.bf16.xpose.msra.mxu0 %v1412_v40 }
 0x273   :  { %v959_v10 = vmul.f32 0.7978846, %v933_v41  ;;  %v934_v16 = vadd.f32 %v908_v42, %v2194_v27  ;;  %v857_v49 = vmul.f32 %v2205_v48, %v2205_v48  ;;  %v2211_v23 = vadd.f32 %v2043_v44, %v817_v36  ;;  %v1384_v52 = vpop.f32.mrb[43].mxu1  ;;  %1414 = vmatprep.subr.bf16.mxu0 %v1676_v58 }
 0x274   :  { %v1034_v9 = vmul.f32 0.5, %v1008_v17  ;;  %v1059_v19 = vmul.f32 %v1033_v32, %v2154_v30 }
 0x275   :  { %1559 = vtanh.f32 %v959_v10  ;;  %v960_v15 = vmul.f32 0.7978846, %v934_v16  ;;  %v883_v45 = vmul.f32 %v857_v49, %v2205_v48  ;;  %v858_v57 = vmul.f32 %v2211_v23, %v2211_v23 }
 0x276   :  { %v1060_v50 = vmul.f32 %v1034_v9, %v2160_v54 }
 0x277   :  { %v1556_v62 = vpop.eup %1555  ;;  %1561 = vtanh.f32 %v960_v15  ;;  %v909_v0 = vmul.f32 0.044715, %v883_v45  ;;  %v884_v25 = vmul.f32 %v858_v57, %v2211_v23 }
 0x278   :  { %v1009_v3 = vadd.f32 1.0, %v1556_v62  ;;  %v822_v28 = vpop.f32.mrb[44].mxu1  ;;  %v1415_v5 = vpack.c.bf16 %v1060_v50, %v1059_v19 }
 0x279   :  { %v1558_v33 = vpop.eup %1557  ;;  %v935_v6 = vadd.f32 %v909_v0, %v2205_v48  ;;  %v910_v8 = vmul.f32 0.044715, %v884_v25  ;;  %v2222_v11 = vadd.f32 %v2043_v44, %v822_v28  ;;  %v1387_v34 = vpop.f32.mrb[45].mxu1 }
 0x27a   :  { %v1035_v51 = vmul.f32 0.5, %v1009_v3  ;;  %v1010_v30 = vadd.f32 1.0, %v1558_v33  ;;  %v825_v59 = vpop.f32.mrb[46].mxu1  ;;  %1416 = vmatpush1.bf16.xpose.msra.mxu0 %v1415_v5 }
 0x27b   :  { %v961_v54 = vmul.f32 0.7978846, %v935_v6  ;;  %v936_v12 = vadd.f32 %v910_v8, %v2211_v23  ;;  %v859_v2 = vmul.f32 %v2222_v11, %v2222_v11  ;;  %v2228_v13 = vadd.f32 %v2043_v44, %v825_v59  ;;  %v1388_v18 = vpop.f32.mrb[47].mxu1  ;;  %1417 = vmatprep.subr.bf16.mxu0 %v1676_v58 }
 0x27c   :  { %v1036_v43 = vmul.f32 0.5, %v1010_v30  ;;  %v1061_v47 = vmul.f32 %v1035_v51, %v2171_v56 }
 0x27d   :  { %1563 = vtanh.f32 %v961_v54  ;;  %v962_v20 = vmul.f32 0.7978846, %v936_v12  ;;  %v885_v39 = vmul.f32 %v859_v2, %v2222_v11  ;;  %v860_v21 = vmul.f32 %v2228_v13, %v2228_v13 }
 0x27e   :  { %v1062_v22 = vmul.f32 %v1036_v43, %v2177_v1 }
 0x27f   :  { %v1560_v24 = vpop.eup %1559  ;;  %1565 = vtanh.f32 %v962_v20  ;;  %v911_v46 = vmul.f32 0.044715, %v885_v39  ;;  %v886_v53 = vmul.f32 %v860_v21, %v2228_v13 }
 0x280   :  { %v1011_v29 = vadd.f32 1.0, %v1560_v24  ;;  %v830_v63 = vpop.f32.mrb[48].mxu1  ;;  %v1418_v31 = vpack.c.bf16 %v1062_v22, %v1061_v47  ;;  %v1151_v24 = vlaneseq }
 0x281   :  { %v1562_v55 = vpop.eup %1561  ;;  %v937_v35 = vadd.f32 %v911_v46, %v2222_v11  ;;  %v912_v38 = vmul.f32 0.044715, %v886_v53  ;;  %v831_v60 = vadd.f32 %v2043_v44, %v830_v63  ;;  %v1391_v61 = vpop.f32.mrb[49].mxu1  ;;  %v1073_v46 = vstv %s2275_s6 }
 0x282   :  { %v1037_v4 = vmul.f32 0.5, %v1011_v29  ;;  %v1012_v26 = vadd.f32 1.0, %v1562_v55  ;;  %v833_v56 = vpop.f32.mrb[50].mxu1  ;;  %1419 = vmatpush1.bf16.xpose.msra.mxu0 %v1418_v31  ;;  %v1152_v29 = vshrl.u32 %v1151_v24, 7  ;;  %vm1165_vm1 = vcmp.lt.s32.totalorder %v1151_v24, 208 }
 0x283   :  { %v963_v1 = vmul.f32 0.7978846, %v937_v35  ;;  %v938_v40 = vadd.f32 %v912_v38, %v2228_v13  ;;  %v861_v14 = vmul.f32 %v831_v60, %v831_v60  ;;  %v834_v41 = vadd.f32 %v2043_v44, %v833_v56  ;;  %v1392_v42 = vpop.f32.mrb[51].mxu1  ;;  %1420 = vmatprep.subr.bf16.mxu0 %v1676_v58 }
 0x284   :  { %v1038_v7 = vmul.f32 0.5, %v1012_v26  ;;  %v1063_v10 = vmul.f32 %v1037_v4, %v2188_v37 }
 0x285   :  { %1567 = vtanh.f32 %v963_v1  ;;  %v964_v32 = vmul.f32 0.7978846, %v938_v40  ;;  %v887_v17 = vmul.f32 %v861_v14, %v831_v60  ;;  %v862_v36 = vmul.f32 %v834_v41, %v834_v41 }
 0x286   :  { %v1064_v16 = vmul.f32 %v1038_v7, %v2194_v27 }
 0x287   :  { %v1564_v49 = vpop.eup %1563  ;;  %1569 = vtanh.f32 %v964_v32  ;;  %v913_v52 = vmul.f32 0.044715, %v887_v17  ;;  %v888_v9 = vmul.f32 %v862_v36, %v834_v41 }
 0x288   :  { %v1013_v15 = vadd.f32 1.0, %v1564_v49  ;;  %v1421_v45 = vpack.c.bf16 %v1064_v16, %v1063_v10 }
 0x289   :  { %v1566_v57 = vpop.eup %1565  ;;  %v939_v44 = vadd.f32 %v913_v52, %v831_v60  ;;  %v914_v19 = vmul.f32 0.044715, %v888_v9 }
 0x28a   :  { %v1039_v50 = vmul.f32 0.5, %v1013_v15  ;;  %v1014_v62 = vadd.f32 1.0, %v1566_v57  ;;  %1422 = vmatpush1.bf16.xpose.msra.mxu0 %v1421_v45 }
 0x28b   :  { %v965_v0 = vmul.f32 0.7978846, %v939_v44  ;;  %v940_v25 = vadd.f32 %v914_v19, %v834_v41  ;;  %1423 = vmatprep.subr.bf16.mxu0 %v1676_v58 }
 0x28c   :  { %v1040_v3 = vmul.f32 0.5, %v1014_v62  ;;  %v1065_v27 = vmul.f32 %v1039_v50, %v2205_v48 }
 0x28d   :  { %1571 = vtanh.f32 %v965_v0  ;;  %v966_v37 = vmul.f32 0.7978846, %v940_v25 }
 0x28e   :  { %v1066_v28 = vmul.f32 %v1040_v3, %v2211_v23 }
 0x28f   :  { %v1568_v5 = vpop.eup %1567  ;;  %1573 = vtanh.f32 %v966_v37 }
 0x290   :  { %v1015_v33 = vadd.f32 1.0, %v1568_v5  ;;  %v1424_v6 = vpack.c.bf16 %v1066_v28, %v1065_v27 }
 0x291   :  { %v1570_v8 = vpop.eup %1569 }
 0x292   :  { %v1041_v34 = vmul.f32 0.5, %v1015_v33  ;;  %v1016_v51 = vadd.f32 1.0, %v1570_v8  ;;  %1425 = vmatpush1.bf16.xpose.msra.mxu0 %v1424_v6 }
 0x293   :  { %1426 = vmatprep.subr.bf16.mxu0 %v1676_v58 }
 0x294   :  { %v1042_v30 = vmul.f32 0.5, %v1016_v51  ;;  %v1067_v59 = vmul.f32 %v1041_v34, %v2222_v11  ;;  %v1071_v11 = vld [vmem:[%s2274_s5] sm:$0x1]  ;;  %s1641_s5 = scalar_lea.vmem %s1175_s20, 32 }
 0x295   :  { %p1642_p10 = scmp.ne.s32.totalorder %s1175_s20, %s1641_s5  ;;  %p1647_p12 = scmp.lt.s32.totalorder %s1641_s5, %s1641_s5 }
 0x296   :  { %v1068_v54 = vmul.f32 %v1042_v30, %v2228_v13  ;;  %v1677_v13 = vmov 1966171168  }
 0x297   :  { %v1572_v12 = vpop.eup %1571  ;;  %v1149_v22 = vunpack.c.l.s4 %v1677_v13  ;;  %p1648_p13 = por %p1647_p12, %p1646_p11 }
 0x298   :  { %v1017_v2 = vadd.f32 1.0, %v1572_v12  ;;  %v1427_v48 = vpack.c.bf16 %v1068_v54, %v1067_v59 }
 0x299   :  { %v1574_v18 = vpop.eup %1573  ;;  %v1150_v53 = vunpack.c.0.s8 %v1149_v22  ;;  %p1649_p0 = pnand %p1648_p13, %p1642_p10 }
 0x29a   :  { %v1043_v23 = vmul.f32 0.5, %v1017_v2  ;;  %v1018_v43 = vadd.f32 1.0, %v1574_v18  ;;  %1428 = vmatpush1.bf16.xpose.msra.mxu0 %v1427_v48 }
 0x29b   :  { %1429 = vmatprep.subr.bf16.mxu0 %v1676_v58  ;;  %v1153_v35 = vsub.s32 %v1150_v53, %v1152_v29 }
 0x29c   :  { %v1044_v20 = vmul.f32 0.5, %v1018_v43  ;;  %v1069_v39 = vmul.f32 %v1043_v23, %v831_v60 }
 0x29e   :  { %v1070_v21 = vmul.f32 %v1044_v20, %v834_v41 }
 0x2a0   :  { %v1430_v47 = vpack.c.bf16 %v1070_v21, %v1069_v39 }
 0x2a2   :  { %1431 = vmatpush1.bf16.xpose.msra.mxu0 %v1430_v47 }
 0x2a9   :  { %1139 = vmatmul.mubr.f32.vlgmr.msra.gmra.mrb[52].mxu0 %v1071_v11 }
 0x37c   :  { %v1140_v58 = vpop.f32.mrb[52].mxu0 }
 0x37d   :  { %v1141_v63 = vadd.f32 %v1140_v58, %v1073_v46  ;;  %v1142_v31 = vpop.f32.mrb[53].mxu0 }
 0x37e   :  { %v1143_v55 = vadd.f32 %v1142_v31, %v1073_v46 }
 0x380   :  { %v1147_v38 = vcombine.low %v1141_v63, %v1143_v55 }
 0x382   :  { %v1154_v60 = vrot.slane %v1147_v38, %v1153_v35 }
 0x384   :  { %v1161_v61 = vrot.slane %v1154_v60, %v1153_v35 }
 0x386   :  { %1167 = vst.msk [vmem:[#allocation9] sm:$0x3] %vm1165_vm1, %v1161_v61 }
 0x387   :  { %1652 = shalt.err (!%p1649_p0)
}
 0x388   :  { %s1653_s22 = scalar_lea.hbm %s2276_s7, 32 }
 0x389   :  { %p1654_p1 = scmp.ne.s32.totalorder %s2276_s7, %s1653_s22  ;;  %p1657_p2 = scmp.lt.u32.totalorder %s1653_s22, %s2276_s7 }
 0x38b   :  { %p1659_p3 = pnand %p1657_p2, %p1654_p1 }
 0x38d   :  { %1662 = shalt.err (!%p1659_p3)
}
 0x38e   :  { %1177 = dma.vmem_to_hbm [thread:$0]  %s1175_s20, 32, %s2276_s7, [#allocation5]  }
 0x38f   :  { %1667 = dma.done.wait [#allocation5], 32  }
 0x390   :  { %1668 = vsyncadd [#allocation5], 4294967264 }
 0x391   :  { %1181 = vsyncpa [#allocation4], 1 }
 0x392   :  { %1182 = vsyncpa [#allocation7], 1 }
 0x393   :  { %1183 = vsyncpa [#allocation5], 1 }

</bundles_post_ra>
